<compile_context>
chip_gen: v7x
topology: tpu7x:2x2x1
jax: 0.10.0
libtpu: 0.0.40
codegen_flags: <defaults>
</compile_context>

<pallas_src>
import functools

import jax
import jax.numpy as jnp
from jax import lax
from jax.experimental import pallas as pl
from jax.experimental.pallas import tpu as pltpu


def _round_up(v: int, m: int) -> int:
    return (v + m - 1) // m * m


def _cdiv(a: int, b: int) -> int:
    return (a + b - 1) // b


def _top_m_kernel(x_ref, z_ref, out_ref, *, k: int, inv_t: float, axis: int,
                  use_fori: bool, bf16_trans: bool):
    x = x_ref[...].astype(jnp.float32)
    z = z_ref[...].astype(jnp.float32)
    keys = jnp.log(x + 1e-30) + z

    def softmax(kv):
        logits = kv * inv_t                               # multiply by 1/t (no divide)
        m = jnp.max(logits, axis=axis, keepdims=True)
        d = logits - m
        if bf16_trans:                                    # v6e/v7x only; default off
            e = jnp.exp(d.astype(jnp.bfloat16)).astype(jnp.float32)
        else:
            e = jnp.exp(d)
        denom = jnp.sum(e, axis=axis, keepdims=True)
        # Exact reciprocal: denom is one value per softmax group, approx is noise.
        return e * pl.reciprocal(denom)

    def masked_log(onehot):
        m = jnp.maximum(1.0 - onehot, 1e-20)
        if bf16_trans:
            return jnp.log(m.astype(jnp.bfloat16)).astype(jnp.float32)
        return jnp.log(m)

    # Iteration 0 peeled: onehot == 0 -> mask == 1 -> log(mask) == 0 (exact).
    onehot = softmax(keys)
    khot = onehot

    if not use_fori:
        for _ in range(k - 1):
            keys = keys + masked_log(onehot)
            onehot = softmax(keys)
            khot = khot + onehot
    else:
        def body(_, carry):
            keys_c, onehot_c, khot_c = carry
            keys_c = keys_c + masked_log(onehot_c)
            onehot_c = softmax(keys_c)
            return keys_c, onehot_c, khot_c + onehot_c
        keys, onehot, khot = lax.fori_loop(0, k - 1, body, (keys, onehot, khot))

    out_ref[...] = khot.astype(out_ref.dtype)             # single store of khot


def _vmem_limit_bytes() -> int:
    """Generation-aware scoped VMEM limit (v7x: 64 MiB physical -> 32 MiB limit;
    v5e/v6e: 128 MiB physical -> 64 MiB limit)."""
    try:
        phys = int(pltpu.get_tpu_info().vmem_capacity_bytes)
    except Exception:
        phys = 64 * 1024 * 1024                            # conservative (v7x per TC)
    return min(phys // 2, 64 * 1024 * 1024)


def _pick_tile(total: int, granule: int, bytes_per_granule: int,
               budget_bytes: int, max_granules: int) -> int:
    """Tile (in elements along the tiled axis) fitting a ~12x-block VMEM budget
    while keeping enough grid steps for v7x 2-TC balance and DMA pipelining."""
    total_g = _cdiv(total, granule)
    budget_g = max(1, budget_bytes // (12 * bytes_per_granule))
    if total_g >= 8:
        target = 8          # >= 4 steps per TC after the v7x megacore split
    elif total_g >= 4:
        target = 4
    elif total_g >= 2:
        target = 2
    else:
        target = 1
    tile_g = max(1, min(budget_g, max_granules, total_g, _cdiv(total_g, target)))
    return tile_g * granule


def top_m(x: jax.Array, z: jax.Array, *, k: int, t: float,
          bf16_transcendentals: bool = False,
          unroll_threshold: int = 8) -> jax.Array:
    """x, z: (..., N); softmax over last axis. Returns khot (float32, same shape)."""
    orig_shape = x.shape
    n = orig_shape[-1]
    in_dtype = jnp.bfloat16 if x.dtype == jnp.bfloat16 else jnp.float32
    x2 = x.reshape(-1, n).astype(in_dtype)
    z2 = z.reshape(-1, n).astype(in_dtype)
    rows = x2.shape[0]

    vmem_limit = _vmem_limit_bytes()
    budget = (vmem_limit * 3) // 4                         # headroom for scratch/spills
    use_fori = (k - 1) > unroll_threshold
    inv_t = float(1.0 / t)

    transposed = n < 128
    if transposed:
        # Lane-dense layout: rows -> lanes (multiple of 128), softmax axis -> sublanes.
        xt, zt = x2.T, z2.T                                # (n, rows)
        n_sub = _round_up(max(n, 1), 8)
        tile_cols = _pick_tile(rows, 128, n_sub * 128 * 4, budget, 32)
        cols_padded = _round_up(rows, tile_cols)
        if cols_padded != rows:
            pad = cols_padded - rows
            # Padded columns are independent softmax groups (x=1, z=0 keeps keys
            # finite) and are sliced off below.
            xt = jnp.pad(xt, ((0, 0), (0, pad)), constant_values=1.0)
            zt = jnp.pad(zt, ((0, 0), (0, pad)), constant_values=0.0)
        grid = (cols_padded // tile_cols,)
        blk = pl.BlockSpec((n, tile_cols), lambda i: (0, i))
        out_shape = jax.ShapeDtypeStruct((n, cols_padded), jnp.float32)
        axis = 0
        args = (xt, zt)
        elems = cols_padded * n
    else:
        n_lane = _round_up(n, 128)
        tile_rows = _pick_tile(rows, 8, n_lane * 8 * 4, budget, 128)
        rows_padded = _round_up(rows, tile_rows)
        if rows_padded != rows:
            pad = rows_padded - rows
            x2 = jnp.pad(x2, ((0, pad), (0, 0)), constant_values=1.0)
            z2 = jnp.pad(z2, ((0, pad), (0, 0)), constant_values=0.0)
        grid = (rows_padded // tile_rows,)
        blk = pl.BlockSpec((tile_rows, n), lambda i: (i, 0))
        out_shape = jax.ShapeDtypeStruct((rows_padded, n), jnp.float32)
        axis = -1
        args = (x2, z2)
        elems = rows_padded * n

    cost = pl.CostEstimate(
        flops=8 * k * elems,                               # VPU elementwise (rough)
        transcendentals=2 * k * elems,                     # exp + log per iteration
        bytes_accessed=elems * (2 * jnp.dtype(in_dtype).itemsize + 4),
    )

    out = pl.pallas_call(
        functools.partial(_top_m_kernel, k=k, inv_t=inv_t, axis=axis,
                          use_fori=use_fori, bf16_trans=bf16_transcendentals),
        out_shape=out_shape,
        grid_spec=pltpu.PrefetchScalarGridSpec(
            num_scalar_prefetch=0,
            grid=grid,
            in_specs=[blk, blk],
            out_specs=blk,
        ),
        compiler_params=pltpu.CompilerParams(
            dimension_semantics=("parallel",),
            vmem_limit_bytes=vmem_limit,
        ),
        cost_estimate=cost,
    )(*args)

    if transposed:
        out = out[:, :rows].T
    else:
        out = out[:rows]
    return out.reshape(orig_shape).astype(jnp.float32)


def top_m_reference(x, z, *, k, t):
    x = x.astype(jnp.float32)
    z = z.astype(jnp.float32)
    keys = jnp.log(x + 1e-30) + z
    onehot = jnp.zeros_like(x)
    khot = jnp.zeros_like(x)
    for _ in range(k):
        mask = jnp.maximum(1.0 - onehot, 1e-20)
        keys = keys + jnp.log(mask)
        onehot = jax.nn.softmax(keys / t, axis=-1)
        khot = khot + onehot
    return khot


if __name__ == "__main__":
    key = jax.random.PRNGKey(0)
    kx, kz = jax.random.split(key)

    # --- Check 1: module-typical shape, N < 128 -> lane-dense transposed path ---
    B, S, N = 2, 8, 32            # softmax over N
    K, T = 3, 0.5                 # module hyperparameters k, t
    x = jax.random.uniform(kx, (B, S, N), dtype=jnp.float32)
    z = jax.random.gumbel(kz, (B, S, N), dtype=jnp.float32)  # stands in for torch Gumbel(0,1)

    out = jax.block_until_ready(top_m(x, z, k=K, t=T))
    ref = top_m_reference(x, z, k=K, t=T)
    assert out.shape == x.shape and out.dtype == jnp.float32
    assert jnp.allclose(out, ref, atol=1e-5, rtol=1e-5), "mismatch vs reference"

    # --- Check 2: row count not divisible by the tile (exercises padding/slice) ---
    kx2, kz2 = jax.random.split(jax.random.PRNGKey(1))
    x2 = jax.random.uniform(kx2, (3, 5, 32), dtype=jnp.float32)
    z2 = jax.random.gumbel(kz2, (3, 5, 32), dtype=jnp.float32)
    out2 = jax.block_until_ready(top_m(x2, z2, k=2, t=1.0))
    ref2 = top_m_reference(x2, z2, k=2, t=1.0)
    assert out2.shape == x2.shape
    assert jnp.allclose(out2, ref2, atol=1e-4, rtol=1e-4), "mismatch vs reference (padded)"

    # --- Check 3: N >= 128 row-major path + fori_loop body (unroll_threshold=0) ---
    kx3, kz3 = jax.random.split(jax.random.PRNGKey(2))
    x3 = jax.random.uniform(kx3, (4, 8, 256), dtype=jnp.float32)
    z3 = jax.random.gumbel(kz3, (4, 8, 256), dtype=jnp.float32)
    out3 = jax.block_until_ready(top_m(x3, z3, k=3, t=0.5, unroll_threshold=0))
    ref3 = top_m_reference(x3, z3, k=3, t=0.5)
    assert out3.shape == x3.shape
    assert jnp.allclose(out3, ref3, atol=1e-4, rtol=1e-4), "mismatch vs reference (N>=128)"

    print("KERNEL_OK")
</pallas_src>

<mosaic_0001>
module attributes {stable_mosaic.version = 11 : i64} {
  func.func @_top_m_kernel(%arg0: i32, %arg1: memref<32x128xf32, #tpu.memory_space<vmem>>, %arg2: memref<32x128xf32, #tpu.memory_space<vmem>>, %arg3: memref<32x128xf32, #tpu.memory_space<vmem>>) attributes {dimension_semantics = [#tpu.dimension_semantics<parallel>], iteration_bounds = array<i64: 1>, scalar_prefetch = 0 : i64, scratch_operands = 0 : i64, tpu.core_type = #tpu.core_type<tc>, window_params = [{transform_indices = @transform_0, window_bounds = array<i64: 32, 128>}, {transform_indices = @transform_1, window_bounds = array<i64: 32, 128>}, {transform_indices = @transform_2, window_bounds = array<i64: 32, 128>}]} {
    %c0 = arith.constant 0 : index
    %c0_0 = arith.constant 0 : index
    %0 = vector.load %arg1[%c0, %c0_0] : memref<32x128xf32, #tpu.memory_space<vmem>>, vector<32x128xf32>
    %c0_1 = arith.constant 0 : index
    %c0_2 = arith.constant 0 : index
    %1 = vector.load %arg2[%c0_1, %c0_2] : memref<32x128xf32, #tpu.memory_space<vmem>>, vector<32x128xf32>
    %cst = arith.constant 1.000000e-30 : f32
    %2 = vector.broadcast %cst : f32 to vector<32x128xf32>
    %3 = arith.addf %0, %2 : vector<32x128xf32>
    %4 = math.log %3 : vector<32x128xf32>
    %5 = arith.addf %4, %1 : vector<32x128xf32>
    %cst_3 = arith.constant 2.000000e+00 : f32
    %6 = vector.broadcast %cst_3 : f32 to vector<32x128xf32>
    %7 = arith.mulf %5, %6 : vector<32x128xf32>
    %cst_4 = arith.constant dense<0xFF800000> : vector<128xf32>
    %8 = vector.multi_reduction <maximumf>, %7, %cst_4 [0] : vector<32x128xf32> to vector<128xf32>
    %9 = vector.shape_cast %8 : vector<128xf32> to vector<1x128xf32>
    %10 = vector.broadcast %9 : vector<1x128xf32> to vector<32x128xf32>
    %11 = arith.subf %7, %10 : vector<32x128xf32>
    %12 = math.exp %11 : vector<32x128xf32>
    %cst_5 = arith.constant dense<0.000000e+00> : vector<128xf32>
    %13 = vector.multi_reduction <add>, %12, %cst_5 [0] : vector<32x128xf32> to vector<128xf32>
    %14 = vector.shape_cast %13 : vector<128xf32> to vector<1x128xf32>
    %15 = tpu.reciprocal %14 : vector<1x128xf32> -> vector<1x128xf32>
    %16 = vector.broadcast %15 : vector<1x128xf32> to vector<32x128xf32>
    %17 = arith.mulf %12, %16 : vector<32x128xf32>
    %cst_6 = arith.constant 1.000000e+00 : f32
    %18 = vector.broadcast %cst_6 : f32 to vector<32x128xf32>
    %19 = arith.subf %18, %17 : vector<32x128xf32>
    %cst_7 = arith.constant 9.99999968E-21 : f32
    %20 = vector.broadcast %cst_7 : f32 to vector<32x128xf32>
    %21 = arith.maximumf %19, %20 : vector<32x128xf32>
    %22 = math.log %21 : vector<32x128xf32>
    %23 = arith.addf %5, %22 : vector<32x128xf32>
    %cst_8 = arith.constant 2.000000e+00 : f32
    %24 = vector.broadcast %cst_8 : f32 to vector<32x128xf32>
    %25 = arith.mulf %23, %24 : vector<32x128xf32>
    %cst_9 = arith.constant dense<0xFF800000> : vector<128xf32>
    %26 = vector.multi_reduction <maximumf>, %25, %cst_9 [0] : vector<32x128xf32> to vector<128xf32>
    %27 = vector.shape_cast %26 : vector<128xf32> to vector<1x128xf32>
    %28 = vector.broadcast %27 : vector<1x128xf32> to vector<32x128xf32>
    %29 = arith.subf %25, %28 : vector<32x128xf32>
    %30 = math.exp %29 : vector<32x128xf32>
    %cst_10 = arith.constant dense<0.000000e+00> : vector<128xf32>
    %31 = vector.multi_reduction <add>, %30, %cst_10 [0] : vector<32x128xf32> to vector<128xf32>
    %32 = vector.shape_cast %31 : vector<128xf32> to vector<1x128xf32>
    %33 = tpu.reciprocal %32 : vector<1x128xf32> -> vector<1x128xf32>
    %34 = vector.broadcast %33 : vector<1x128xf32> to vector<32x128xf32>
    %35 = arith.mulf %30, %34 : vector<32x128xf32>
    %36 = arith.addf %17, %35 : vector<32x128xf32>
    %cst_11 = arith.constant 1.000000e+00 : f32
    %37 = vector.broadcast %cst_11 : f32 to vector<32x128xf32>
    %38 = arith.subf %37, %35 : vector<32x128xf32>
    %cst_12 = arith.constant 9.99999968E-21 : f32
    %39 = vector.broadcast %cst_12 : f32 to vector<32x128xf32>
    %40 = arith.maximumf %38, %39 : vector<32x128xf32>
    %41 = math.log %40 : vector<32x128xf32>
    %42 = arith.addf %23, %41 : vector<32x128xf32>
    %cst_13 = arith.constant 2.000000e+00 : f32
    %43 = vector.broadcast %cst_13 : f32 to vector<32x128xf32>
    %44 = arith.mulf %42, %43 : vector<32x128xf32>
    %cst_14 = arith.constant dense<0xFF800000> : vector<128xf32>
    %45 = vector.multi_reduction <maximumf>, %44, %cst_14 [0] : vector<32x128xf32> to vector<128xf32>
    %46 = vector.shape_cast %45 : vector<128xf32> to vector<1x128xf32>
    %47 = vector.broadcast %46 : vector<1x128xf32> to vector<32x128xf32>
    %48 = arith.subf %44, %47 : vector<32x128xf32>
    %49 = math.exp %48 : vector<32x128xf32>
    %cst_15 = arith.constant dense<0.000000e+00> : vector<128xf32>
    %50 = vector.multi_reduction <add>, %49, %cst_15 [0] : vector<32x128xf32> to vector<128xf32>
    %51 = vector.shape_cast %50 : vector<128xf32> to vector<1x128xf32>
    %52 = tpu.reciprocal %51 : vector<1x128xf32> -> vector<1x128xf32>
    %53 = vector.broadcast %52 : vector<1x128xf32> to vector<32x128xf32>
    %54 = arith.mulf %49, %53 : vector<32x128xf32>
    %55 = arith.addf %36, %54 : vector<32x128xf32>
    %c0_16 = arith.constant 0 : index
    %c0_17 = arith.constant 0 : index
    %56 = vector.load %arg3[%c0_16, %c0_17] : memref<32x128xf32, #tpu.memory_space<vmem>>, vector<32x128xf32>
    tpu.vector_store %arg3[%c0_16, %c0_17], %55 {strides = array<i32>} : memref<32x128xf32, #tpu.memory_space<vmem>>, vector<32x128xf32>,
    return
  }
  func.func @transform_0(%arg0: i32) -> (i32, i32) {
    %c0_i32 = arith.constant 0 : i32
    %c0_i32_0 = arith.constant 0 : i32
    return %c0_i32, %arg0 : i32, i32
  }
  func.func @transform_1(%arg0: i32) -> (i32, i32) {
    %c0_i32 = arith.constant 0 : i32
    %c0_i32_0 = arith.constant 0 : i32
    return %c0_i32, %arg0 : i32, i32
  }
  func.func @transform_2(%arg0: i32) -> (i32, i32) {
    %c0_i32 = arith.constant 0 : i32
    %c0_i32_0 = arith.constant 0 : i32
    return %c0_i32, %arg0 : i32, i32
  }
}

</mosaic_0001>

<bundles_post_ra>
// kernel: tpu_custom_call.1
= control target key start
LH: loop header
LB: loop body
LE: loop exit
PB: predicated region body
PF: predicated region fallthrough
CT: control target
= control target key end

     0   :  { %7 = vsyncpa [#allocation3], 0  ;;  %s511_s0 = inlined_call_operand.hbm [shape: f32[32,128], index: 0, kind: input, shape index: {}]   ;;  %s512_s1 = inlined_call_operand.hbm [shape: f32[32,128], index: 1, kind: input, shape index: {}]   ;;  %s513_s2 = inlined_call_operand.hbm [shape: f32[32,128], index: 2, kind: output, shape index: {}]  }
   0x1   :  { %8 = vsyncpa [#allocation6], 0 }
   0x2   :  { %9 = vsyncpa [#allocation4], 0  ;;  %s382_s9 = smov [#allocation2]   ;;  %s310_s13 = scalar_lea.hbm %s511_s0, 512 }
   0x3   :  { %s15_s10 = sshll.u32 %s382_s9, 4  ;;  %p311_p0 = scmp.ne.s32.totalorder %s511_s0, %s310_s13  ;;  %s16_s10 = int_to_ptr.vmem [resolvable:$true] %s15_s10 }
   0x4   :  { %p314_p1 = scmp.lt.u32.totalorder %s310_s13, %s511_s0 }
   0x6   :  { %p316_p2 = pnand %p314_p1, %p311_p0 }
   0x8   :  { %319 = shalt.err (!%p316_p2)
}
   0x9   :  { %s320_s18 = scalar_lea.vmem %s16_s10, 512  ;;  %p325_p4 = scmp.lt.s32.totalorder %s16_s10, %s16_s10 }
   0xa   :  { %p321_p3 = scmp.ne.s32.totalorder %s16_s10, %s320_s18  ;;  %p326_p5 = scmp.lt.s32.totalorder %s320_s18, %s320_s18 }
   0xc   :  { %p327_p6 = por %p326_p5, %p325_p4 }
   0xe   :  { %p328_p7 = pnand %p327_p6, %p321_p3 }
  0x10   :  { %331 = shalt.err (!%p328_p7)
}
  0x11   :  { %s383_s19 = smov 128   ;;  %s384_s20 = smov 8  }
  0x12   :  { %21 = dma.hbm_to_vmem [thread:$0]  %s511_s0, 512, %s16_s10, [#allocation3], %s383_s19, %s383_s19, %s384_s20  }
  0x13   :  { %s385_s23 = smov [#allocation5]   ;;  %s332_s27 = scalar_lea.hbm %s512_s1, 512 }
  0x14   :  { %s27_s24 = sshll.u32 %s385_s23, 4  ;;  %p333_p8 = scmp.ne.s32.totalorder %s512_s1, %s332_s27  ;;  %s28_s24 = int_to_ptr.vmem [resolvable:$true] %s27_s24 }
  0x15   :  { %p336_p9 = scmp.lt.u32.totalorder %s332_s27, %s512_s1 }
  0x17   :  { %p338_p10 = pnand %p336_p9, %p333_p8 }
  0x19   :  { %341 = shalt.err (!%p338_p10)
}
  0x1a   :  { %s342_s4 = scalar_lea.vmem %s28_s24, 512  ;;  %p347_p12 = scmp.lt.s32.totalorder %s28_s24, %s28_s24 }
  0x1b   :  { %p343_p11 = scmp.ne.s32.totalorder %s28_s24, %s342_s4  ;;  %p348_p13 = scmp.lt.s32.totalorder %s342_s4, %s342_s4 }
  0x1d   :  { %p349_p0 = por %p348_p13, %p347_p12 }
  0x1f   :  { %p350_p1 = pnand %p349_p0, %p343_p11 }
  0x21   :  { %353 = shalt.err (!%p350_p1)
}
  0x22   :  { %33 = dma.hbm_to_vmem [thread:$0]  %s512_s1, 512, %s28_s24, [#allocation6], %s383_s19, %s383_s19, %s384_s20  }
  0x23   :  { %376 = dma.done.wait [#allocation3], 512  }
  0x24   :  { %377 = vsyncadd [#allocation3], 4294966784 }
  0x25   :  { %378 = dma.done.wait [#allocation6], 512  }
  0x26   :  { %379 = vsyncadd [#allocation6], 4294966784  ;;  %v40_v0 = vld [vmem:[#allocation2] sm:$0xff]  ;;  %v41_v1 = vld [vmem:[#allocation2 + $0x8] sm:$0xff]  ;;  %s386_s1 = smov [#allocation7]  }
  0x27   :  { %v42_v2 = vld [vmem:[#allocation2 + $0x10] sm:$0xff]  ;;  %v43_v3 = vld [vmem:[#allocation2 + $0x18] sm:$0xff]  ;;  %v48_v4 = vadd.f32 1e-30, %v40_v0  ;;  %v49_v5 = vadd.f32 1e-30, %v41_v1 }
  0x28   :  { %v50_v6 = vadd.f32 1e-30, %v42_v2  ;;  %v51_v7 = vadd.f32 1e-30, %v43_v3  ;;  %v44_v9 = vld [vmem:[#allocation5] sm:$0xff]  ;;  %v45_v11 = vld [vmem:[#allocation5 + $0x8] sm:$0xff] }
  0x29   :  { %256 = vlog2.f32 %v48_v4  ;;  %v46_v14 = vld [vmem:[#allocation5 + $0x10] sm:$0xff]  ;;  %v47_v17 = vld [vmem:[#allocation5 + $0x18] sm:$0xff]  ;;  %s238_s6 = sshll.u32 %s386_s1, 4  ;;  %s239_s6 = int_to_ptr.vmem [resolvable:$true] %s238_s6 }
  0x2a   :  { %258 = vlog2.f32 %v49_v5  ;;  %s354_s7 = scalar_lea.vmem %s239_s6, 512  ;;  %p359_p3 = scmp.lt.s32.totalorder %s239_s6, %s239_s6 }
  0x2b   :  { %260 = vlog2.f32 %v50_v6  ;;  %p355_p2 = scmp.ne.s32.totalorder %s239_s6, %s354_s7  ;;  %p360_p4 = scmp.lt.s32.totalorder %s354_s7, %s354_s7 }
  0x2c   :  { %262 = vlog2.f32 %v51_v7 }
  0x2d   :  { %p361_p5 = por %p360_p4, %p359_p3 }
  0x2f   :  { %p362_p6 = pnand %p361_p5, %p355_p2 }
  0x33   :  { %v257_v8 = vpop.eup %256 }
  0x34   :  { %v259_v10 = vpop.eup %258  ;;  %v53_v12 = vmul.f32 0.6931472, %v257_v8 }
  0x35   :  { %v261_v13 = vpop.eup %260  ;;  %v55_v15 = vmul.f32 0.6931472, %v259_v10 }
  0x36   :  { %v263_v16 = vpop.eup %262  ;;  %v57_v18 = vmul.f32 0.6931472, %v261_v13  ;;  %v432_v19 = vadd.f32 %v53_v12, %v44_v9 }
  0x37   :  { %v59_v20 = vmul.f32 0.6931472, %v263_v16  ;;  %v434_v21 = vadd.f32 %v55_v15, %v45_v11 }
  0x38   :  { %v436_v22 = vadd.f32 %v57_v18, %v46_v14  ;;  %v64_v23 = vmul.f32 2.0, %v432_v19 }
  0x39   :  { %v439_v24 = vadd.f32 %v59_v20, %v47_v17  ;;  %v65_v25 = vmul.f32 2.0, %v434_v21 }
  0x3a   :  { %v66_v26 = vmul.f32 2.0, %v436_v22 }
  0x3b   :  { %v67_v27 = vmul.f32 2.0, %v439_v24  ;;  %v68_v28 = vmax.f32 %v64_v23, %v65_v25 }
  0x3d   :  { %v69_v29 = vmax.f32 %v66_v26, %v67_v27 }
  0x3f   :  { %v70_v30 = vmax.f32 %v68_v28, %v69_v29 }
  0x41   :  { %v71_v31 = vrot.slane %v70_v30, 4 }
  0x43   :  { %v72_v32 = vmax.f32 %v70_v30, %v71_v31 }
  0x45   :  { %v73_v33 = vrot.slane %v72_v32, 2 }
  0x47   :  { %v74_v34 = vmax.f32 %v72_v32, %v73_v33 }
  0x49   :  { %v75_v35 = vrot.slane %v74_v34, 1 }
  0x4b   :  { %v76_v36 = vmax.f32 %v74_v34, %v75_v35 }
  0x4d   :  { %v77_v37 = vsub.f32 %v64_v23, %v76_v36  ;;  %v78_v38 = vsub.f32 %v65_v25, %v76_v36  ;;  %v79_v39 = vsub.f32 %v66_v26, %v76_v36  ;;  %v80_v40 = vsub.f32 %v67_v27, %v76_v36 }
  0x4f   :  { %v81_v41 = vmul.f32 1.442695, %v77_v37  ;;  %v83_v42 = vmul.f32 1.442695, %v78_v38  ;;  %v85_v43 = vmul.f32 1.442695, %v79_v39 }
  0x50   :  { %v87_v44 = vmul.f32 1.442695, %v80_v40 }
  0x51   :  { %264 = vpow2.f32 %v81_v41 }
  0x52   :  { %266 = vpow2.f32 %v83_v42 }
  0x53   :  { %268 = vpow2.f32 %v85_v43 }
  0x54   :  { %270 = vpow2.f32 %v87_v44 }
  0x5b   :  { %v265_v45 = vpop.eup %264 }
  0x5c   :  { %v267_v46 = vpop.eup %266 }
  0x5d   :  { %v269_v47 = vpop.eup %268  ;;  %v89_v48 = vadd.f32 %v267_v46, %v265_v45 }
  0x5e   :  { %v271_v49 = vpop.eup %270 }
  0x5f   :  { %v90_v50 = vadd.f32 %v269_v47, %v89_v48 }
  0x61   :  { %v91_v51 = vadd.f32 %v271_v49, %v90_v50 }
  0x63   :  { %v92_v52 = vrot.slane %v91_v51, 4 }
  0x65   :  { %v93_v53 = vadd.f32 %v92_v52, %v91_v51 }
  0x67   :  { %v94_v54 = vrot.slane %v93_v53, 2 }
  0x69   :  { %v95_v55 = vadd.f32 %v94_v54, %v93_v53 }
  0x6b   :  { %v96_v56 = vrot.slane %v95_v55, 1 }
  0x6d   :  { %v97_v57 = vadd.f32 %v96_v56, %v95_v55 }
  0x6f   :  { %272 = vrcp.f32 %v97_v57 }
  0x79   :  { %v273_v58 = vpop.eup %272 }
  0x7a   :  { %v444_v59 = vmul.f32 %v273_v58, %v265_v45  ;;  %v446_v60 = vmul.f32 %v273_v58, %v267_v46  ;;  %v448_v61 = vmul.f32 %v273_v58, %v269_v47  ;;  %v450_v62 = vmul.f32 %v273_v58, %v271_v49 }
  0x7c   :  { %v103_v63 = vsub.f32 1.0, %v444_v59  ;;  %v104_v0 = vsub.f32 1.0, %v446_v60  ;;  %v105_v1 = vsub.f32 1.0, %v448_v61  ;;  %v106_v2 = vsub.f32 1.0, %v450_v62 }
  0x7e   :  { %v107_v3 = vmax.f32 %v103_v63, 1e-20  ;;  %v108_v4 = vmax.f32 %v104_v0, 1e-20  ;;  %v109_v5 = vmax.f32 %v105_v1, 1e-20 }
  0x7f   :  { %v110_v6 = vmax.f32 %v106_v2, 1e-20 }
  0x80   :  { %274 = vlog2.f32 %v107_v3 }
  0x81   :  { %276 = vlog2.f32 %v108_v4 }
  0x82   :  { %278 = vlog2.f32 %v109_v5 }
  0x83   :  { %280 = vlog2.f32 %v110_v6 }
  0x8a   :  { %v275_v7 = vpop.eup %274 }
  0x8b   :  { %v277_v8 = vpop.eup %276  ;;  %v112_v9 = vmul.f32 0.6931472, %v275_v7 }
  0x8c   :  { %v279_v10 = vpop.eup %278  ;;  %v114_v11 = vmul.f32 0.6931472, %v277_v8 }
  0x8d   :  { %v281_v12 = vpop.eup %280  ;;  %v116_v13 = vmul.f32 0.6931472, %v279_v10  ;;  %v457_v14 = vadd.f32 %v112_v9, %v432_v19 }
  0x8e   :  { %v118_v15 = vmul.f32 0.6931472, %v281_v12  ;;  %v460_v16 = vadd.f32 %v114_v11, %v434_v21 }
  0x8f   :  { %v463_v17 = vadd.f32 %v116_v13, %v436_v22  ;;  %v123_v18 = vmul.f32 2.0, %v457_v14 }
  0x90   :  { %v467_v20 = vadd.f32 %v118_v15, %v439_v24  ;;  %v124_v23 = vmul.f32 2.0, %v460_v16 }
  0x91   :  { %v125_v25 = vmul.f32 2.0, %v463_v17 }
  0x92   :  { %v126_v26 = vmul.f32 2.0, %v467_v20  ;;  %v127_v19 = vmax.f32 %v123_v18, %v124_v23 }
  0x94   :  { %v128_v27 = vmax.f32 %v125_v25, %v126_v26 }
  0x96   :  { %v129_v28 = vmax.f32 %v127_v19, %v128_v27 }
  0x98   :  { %v130_v29 = vrot.slane %v129_v28, 4 }
  0x9a   :  { %v131_v21 = vmax.f32 %v129_v28, %v130_v29 }
  0x9c   :  { %v132_v30 = vrot.slane %v131_v21, 2 }
  0x9e   :  { %v133_v31 = vmax.f32 %v131_v21, %v132_v30 }
  0xa0   :  { %v134_v22 = vrot.slane %v133_v31, 1 }
  0xa2   :  { %v135_v32 = vmax.f32 %v133_v31, %v134_v22 }
  0xa4   :  { %v136_v33 = vsub.f32 %v123_v18, %v135_v32  ;;  %v137_v34 = vsub.f32 %v124_v23, %v135_v32  ;;  %v138_v35 = vsub.f32 %v125_v25, %v135_v32  ;;  %v139_v24 = vsub.f32 %v126_v26, %v135_v32 }
  0xa6   :  { %v140_v36 = vmul.f32 1.442695, %v136_v33  ;;  %v142_v37 = vmul.f32 1.442695, %v137_v34  ;;  %v144_v38 = vmul.f32 1.442695, %v138_v35 }
  0xa7   :  { %v146_v39 = vmul.f32 1.442695, %v139_v24 }
  0xa8   :  { %282 = vpow2.f32 %v140_v36 }
  0xa9   :  { %284 = vpow2.f32 %v142_v37 }
  0xaa   :  { %286 = vpow2.f32 %v144_v38 }
  0xab   :  { %288 = vpow2.f32 %v146_v39 }
  0xb2   :  { %v283_v40 = vpop.eup %282 }
  0xb3   :  { %v285_v41 = vpop.eup %284 }
  0xb4   :  { %v287_v42 = vpop.eup %286  ;;  %v148_v43 = vadd.f32 %v285_v41, %v283_v40 }
  0xb5   :  { %v289_v44 = vpop.eup %288 }
  0xb6   :  { %v149_v45 = vadd.f32 %v287_v42, %v148_v43 }
  0xb8   :  { %v150_v46 = vadd.f32 %v289_v44, %v149_v45 }
  0xba   :  { %v151_v47 = vrot.slane %v150_v46, 4 }
  0xbc   :  { %v152_v48 = vadd.f32 %v151_v47, %v150_v46 }
  0xbe   :  { %v153_v49 = vrot.slane %v152_v48, 2 }
  0xc0   :  { %v154_v50 = vadd.f32 %v153_v49, %v152_v48 }
  0xc2   :  { %v155_v51 = vrot.slane %v154_v50, 1 }
  0xc4   :  { %v156_v52 = vadd.f32 %v155_v51, %v154_v50 }
  0xc6   :  { %290 = vrcp.f32 %v156_v52 }
  0xd0   :  { %v291_v53 = vpop.eup %290 }
  0xd1   :  { %v472_v54 = vmul.f32 %v291_v53, %v283_v40  ;;  %v474_v55 = vmul.f32 %v291_v53, %v285_v41  ;;  %v476_v56 = vmul.f32 %v291_v53, %v287_v42  ;;  %v478_v57 = vmul.f32 %v291_v53, %v289_v44 }
  0xd3   :  { %v166_v58 = vsub.f32 1.0, %v472_v54  ;;  %v167_v63 = vsub.f32 1.0, %v474_v55  ;;  %v168_v0 = vsub.f32 1.0, %v476_v56  ;;  %v169_v1 = vsub.f32 1.0, %v478_v57 }
  0xd4   :  { %v162_v52 = vadd.f32 %v472_v54, %v444_v59  ;;  %v163_v53 = vadd.f32 %v474_v55, %v446_v60 }
  0xd5   :  { %v170_v2 = vmax.f32 %v166_v58, 1e-20  ;;  %v171_v3 = vmax.f32 %v167_v63, 1e-20  ;;  %v172_v4 = vmax.f32 %v168_v0, 1e-20  ;;  %v164_v58 = vadd.f32 %v476_v56, %v448_v61 }
  0xd6   :  { %v173_v5 = vmax.f32 %v169_v1, 1e-20  ;;  %v165_v63 = vadd.f32 %v478_v57, %v450_v62 }
  0xd7   :  { %292 = vlog2.f32 %v170_v2 }
  0xd8   :  { %294 = vlog2.f32 %v171_v3 }
  0xd9   :  { %296 = vlog2.f32 %v172_v4 }
  0xda   :  { %298 = vlog2.f32 %v173_v5 }
  0xe1   :  { %v293_v6 = vpop.eup %292 }
  0xe2   :  { %v295_v7 = vpop.eup %294  ;;  %v175_v8 = vmul.f32 0.6931472, %v293_v6 }
  0xe3   :  { %v297_v9 = vpop.eup %296  ;;  %v177_v10 = vmul.f32 0.6931472, %v295_v7 }
  0xe4   :  { %v299_v11 = vpop.eup %298  ;;  %v179_v12 = vmul.f32 0.6931472, %v297_v9  ;;  %v182_v13 = vadd.f32 %v175_v8, %v457_v14 }
  0xe5   :  { %v181_v15 = vmul.f32 0.6931472, %v299_v11  ;;  %v183_v18 = vadd.f32 %v177_v10, %v460_v16 }
  0xe6   :  { %v184_v23 = vadd.f32 %v179_v12, %v463_v17  ;;  %v186_v25 = vmul.f32 2.0, %v182_v13 }
  0xe7   :  { %v185_v26 = vadd.f32 %v181_v15, %v467_v20  ;;  %v187_v19 = vmul.f32 2.0, %v183_v18 }
  0xe8   :  { %v188_v27 = vmul.f32 2.0, %v184_v23 }
  0xe9   :  { %v189_v28 = vmul.f32 2.0, %v185_v26  ;;  %v190_v29 = vmax.f32 %v186_v25, %v187_v19 }
  0xeb   :  { %v191_v21 = vmax.f32 %v188_v27, %v189_v28 }
  0xed   :  { %v192_v30 = vmax.f32 %v190_v29, %v191_v21 }
  0xef   :  { %v193_v31 = vrot.slane %v192_v30, 4 }
  0xf1   :  { %v194_v22 = vmax.f32 %v192_v30, %v193_v31 }
  0xf3   :  { %v195_v32 = vrot.slane %v194_v22, 2 }
  0xf5   :  { %v196_v33 = vmax.f32 %v194_v22, %v195_v32 }
  0xf7   :  { %v197_v34 = vrot.slane %v196_v33, 1 }
  0xf9   :  { %v198_v14 = vmax.f32 %v196_v33, %v197_v34 }
  0xfb   :  { %v199_v35 = vsub.f32 %v186_v25, %v198_v14  ;;  %v200_v24 = vsub.f32 %v187_v19, %v198_v14  ;;  %v201_v16 = vsub.f32 %v188_v27, %v198_v14  ;;  %v202_v36 = vsub.f32 %v189_v28, %v198_v14 }
  0xfd   :  { %v203_v17 = vmul.f32 1.442695, %v199_v35  ;;  %v205_v37 = vmul.f32 1.442695, %v200_v24  ;;  %v207_v38 = vmul.f32 1.442695, %v201_v16 }
  0xfe   :  { %v209_v20 = vmul.f32 1.442695, %v202_v36 }
  0xff   :  { %300 = vpow2.f32 %v203_v17 }
 0x100   :  { %302 = vpow2.f32 %v205_v37 }
 0x101   :  { %304 = vpow2.f32 %v207_v38 }
 0x102   :  { %306 = vpow2.f32 %v209_v20 }
 0x109   :  { %v301_v39 = vpop.eup %300 }
 0x10a   :  { %v303_v40 = vpop.eup %302 }
 0x10b   :  { %v305_v41 = vpop.eup %304  ;;  %v211_v42 = vadd.f32 %v303_v40, %v301_v39 }
 0x10c   :  { %v307_v43 = vpop.eup %306 }
 0x10d   :  { %v212_v44 = vadd.f32 %v305_v41, %v211_v42 }
 0x10f   :  { %v213_v45 = vadd.f32 %v307_v43, %v212_v44 }
 0x111   :  { %v214_v46 = vrot.slane %v213_v45, 4 }
 0x113   :  { %v215_v47 = vadd.f32 %v214_v46, %v213_v45 }
 0x115   :  { %v216_v48 = vrot.slane %v215_v47, 2 }
 0x117   :  { %v217_v49 = vadd.f32 %v216_v48, %v215_v47 }
 0x119   :  { %v218_v50 = vrot.slane %v217_v49, 1 }
 0x11b   :  { %v219_v51 = vadd.f32 %v218_v50, %v217_v49 }
 0x11d   :  { %308 = vrcp.f32 %v219_v51 }
 0x127   :  { %v309_v0 = vpop.eup %308 }
 0x128   :  { %v221_v1 = vmul.f32 %v309_v0, %v301_v39  ;;  %v222_v2 = vmul.f32 %v309_v0, %v303_v40  ;;  %v223_v3 = vmul.f32 %v309_v0, %v305_v41  ;;  %v224_v4 = vmul.f32 %v309_v0, %v307_v43 }
 0x12a   :  { %v225_v5 = vadd.f32 %v221_v1, %v162_v52  ;;  %v226_v6 = vadd.f32 %v222_v2, %v163_v53  ;;  %v227_v7 = vadd.f32 %v223_v3, %v164_v58  ;;  %v228_v59 = vadd.f32 %v224_v4, %v165_v63 }
 0x12c   :  { %229 = vst [vmem:[#allocation7] sm:$0xff] %v225_v5  ;;  %230 = vst [vmem:[#allocation7 + $0x8] sm:$0xff] %v226_v6 }
 0x12d   :  { %231 = vst [vmem:[#allocation7 + $0x10] sm:$0xff] %v227_v7  ;;  %232 = vst [vmem:[#allocation7 + $0x18] sm:$0xff] %v228_v59 }
 0x12e   :  { %365 = shalt.err (!%p362_p6)
}
 0x12f   :  { %s366_s10 = scalar_lea.hbm %s513_s2, 512 }
 0x130   :  { %p367_p7 = scmp.ne.s32.totalorder %s513_s2, %s366_s10  ;;  %p370_p8 = scmp.lt.u32.totalorder %s366_s10, %s513_s2 }
 0x132   :  { %p372_p9 = pnand %p370_p8, %p367_p7 }
 0x134   :  { %375 = shalt.err (!%p372_p9)
}
 0x135   :  { %244 = dma.vmem_to_hbm [thread:$0]  %s239_s6, 512, %s513_s2, [#allocation4], %s383_s19, %s383_s19, %s384_s20  }
 0x136   :  { %380 = dma.done.wait [#allocation4], 512  }
 0x137   :  { %381 = vsyncadd [#allocation4], 4294966784 }
 0x138   :  { %248 = vsyncpa [#allocation3], 1 }
 0x139   :  { %249 = vsyncpa [#allocation6], 1 }
 0x13a   :  { %250 = vsyncpa [#allocation4], 1 }

</bundles_post_ra>
